<compile_context>
chip_gen: v6e
topology: v6e:2x2x1
jax: 0.10.0
libtpu: 0.0.40
codegen_flags: <defaults>
</compile_context>

<pallas_src>
import functools
import math

import jax
import jax.numpy as jnp
import numpy as np
from jax.experimental import pallas as pl
from jax.experimental.pallas import tpu as pltpu

_HALO = 128  # right-halo width (one lane tile); requires kernel_size - 1 <= 128


def _conv1d_im2col_kernel(w_ref, b_ref, xa_ref, xh_ref, o_ref, *, k_taps):
    # w_ref:  (C_out, K*C_in)   im2col weight (resident; constant index map)
    # b_ref:  (C_out, 1)        f32 bias (resident)
    # xa_ref: (1, C_in, lt)     main input tile of the padded NCL input
    # xh_ref: (1, C_in, 128)    right-halo columns immediately after the tile
    # o_ref:  (1, C_out, lt)    output tile (lane-dense along L)
    lt = o_ref.shape[2]
    x_full = jnp.concatenate([xa_ref[0], xh_ref[0]], axis=1)      # (C_in, lt+128)
    # Build the stacked im2col operand ONCE: row (k*C_in + i) = x_pad[i, l + k].
    x_stack = jnp.concatenate(
        [x_full[:, k:k + lt] for k in range(k_taps)], axis=0)     # (K*C_in, lt)
    acc = jnp.dot(w_ref[...], x_stack, preferred_element_type=jnp.float32)
    o_ref[0] = (acc + b_ref[...]).astype(o_ref.dtype)


def _conv1d_pointwise_kernel(w_ref, b_ref, xa_ref, o_ref):
    # K == 1 fast path: single (C_out, C_in) @ (C_in, lt) dot; no halo/shifts.
    acc = jnp.dot(w_ref[...], xa_ref[0], preferred_element_type=jnp.float32)
    o_ref[0] = (acc + b_ref[...]).astype(o_ref.dtype)


def _round_up(x, m):
    return ((x + m - 1) // m) * m


def _select_tile(*, L_out, B, C_in, C_out, K, in_itemsize, out_itemsize, l_tile):
    """Pick an L tile (multiple of 128) that fits the per-generation VMEM budget."""
    try:
        info = pltpu.get_tpu_info()
        vmem_cap = int(getattr(info, "vmem_capacity_bytes", 0)) or (64 << 20)
    except Exception:
        vmem_cap = 64 << 20  # conservative fallback (v7x per-TensorCore size)

    # Working-set budget per grid step with headroom for Mosaic internals:
    # v5e/v6e (128 MiB) -> 56 MiB; v7x (64 MiB per TC) -> ~28 MiB.
    budget = min(int(vmem_cap * 0.45), 56 << 20)

    halo = _HALO if K > 1 else 0
    lt = _round_up(min(max(l_tile, _HALO), max(L_out, 1)), _HALO)
    while lt > _HALO:
        blocks = (2 * C_in * (lt + halo) * in_itemsize        # dbl-buffered inputs
                  + 2 * C_out * lt * out_itemsize             # dbl-buffered output
                  + 2 * (C_out * K * C_in + C_out) * 4)       # weights + bias
        temps = (C_in * (lt + halo) * in_itemsize             # x_full
                 + (K * C_in * lt * in_itemsize if K > 1 else 0)   # im2col stack
                 + C_out * lt * 4)                             # f32 accumulator
        if blocks + temps <= budget:
            break
        lt = _round_up(lt // 2, _HALO)

    # v7x shards the "parallel" grid axes over 2 TensorCores: make sure there
    # are at least 2 blocks when the problem is big enough to split.
    if B * pl.cdiv(L_out, lt) < 2 and L_out > _HALO:
        lt = _round_up(pl.cdiv(L_out, 2), _HALO)

    vmem_limit = min(int(vmem_cap * 0.75), 96 << 20)
    return lt, vmem_limit


def conv_norm_forward(signal, weight, bias=None, *, stride=1, dilation=1,
                      padding=None, l_tile=2048, mxu_dtype=jnp.bfloat16):
    """ConvNorm.forward.

    signal: (B, C_in, L) NCL, weight: (C_out, C_in, K), bias: (C_out,) or None.
    mxu_dtype=jnp.bfloat16 (default) runs the MXU with bf16 operands and f32
    accumulation; mxu_dtype=None keeps f32 operands (module-exact numerics).
    """
    assert stride == 1 and dilation == 1  # TODO(synk): general stride/dilation
    C_out, C_in, K = weight.shape
    if padding is None:
        assert K % 2 == 1
        padding = (dilation * (K - 1)) // 2
    B, _, L = signal.shape
    L_out = L + 2 * padding - dilation * (K - 1)
    assert L_out >= 1
    assert K - 1 <= _HALO, "kernel_size too large for the fixed 128-column halo"

    out_dtype = signal.dtype
    if bias is None:
        bias = jnp.zeros((C_out,), jnp.float32)

    in_dtype = out_dtype if mxu_dtype is None else mxu_dtype
    lt, vmem_limit = _select_tile(
        L_out=L_out, B=B, C_in=C_in, C_out=C_out, K=K,
        in_itemsize=np.dtype(in_dtype).itemsize,
        out_itemsize=np.dtype(out_dtype).itemsize,
        l_tile=l_tile)
    n_t = pl.cdiv(L_out, lt)

    halo = _HALO if K > 1 else 0
    Lp = n_t * lt + halo  # every (main + halo) input block is fully in bounds

    # Single wrapper-side cast + pad (the DMA then moves bf16 when enabled).
    x = signal if mxu_dtype is None else signal.astype(mxu_dtype)
    x_pad = jnp.pad(x, ((0, 0), (0, 0), (padding, Lp - padding - L)))

    # im2col weight: W2[o, k*C_in + i] = weight[o, i, k]; cast once here.
    w2 = jnp.transpose(weight, (0, 2, 1)).reshape(C_out, K * C_in)
    if mxu_dtype is not None:
        w2 = w2.astype(mxu_dtype)
    b_col = bias.astype(jnp.float32).reshape(C_out, 1)

    # Weight / bias: constant block index -> fetched once, stay VMEM-resident.
    # TODO(synk): mark these pipeline_mode=pl.Buffered(1) once single-buffered
    # resident inputs are universally supported (saves one redundant weight
    # copy, which matters most against v7x's 64 MiB VMEM).
    w_spec = pl.BlockSpec((C_out, K * C_in), lambda bi, li: (0, 0))
    b_spec = pl.BlockSpec((C_out, 1), lambda bi, li: (0, 0))
    xa_spec = pl.BlockSpec((1, C_in, lt), lambda bi, li: (bi, 0, li))
    out_spec = pl.BlockSpec((1, C_out, lt), lambda bi, li: (bi, 0, li))

    compiler_params = pltpu.CompilerParams(
        dimension_semantics=("parallel", "parallel"),
        vmem_limit_bytes=vmem_limit)

    out_shape = jax.ShapeDtypeStruct((B, C_out, L_out), out_dtype)

    if K == 1:
        return pl.pallas_call(
            _conv1d_pointwise_kernel,
            out_shape=out_shape,
            grid=(B, n_t),
            in_specs=[w_spec, b_spec, xa_spec],
            out_specs=out_spec,
            compiler_params=compiler_params,
        )(w2, b_col, x_pad)

    halo_blocks_per_tile = lt // _HALO
    xh_spec = pl.BlockSpec(
        (1, C_in, _HALO),
        lambda bi, li: (bi, 0, (li + 1) * halo_blocks_per_tile))
    kernel = functools.partial(_conv1d_im2col_kernel, k_taps=K)
    return pl.pallas_call(
        kernel,
        out_shape=out_shape,
        grid=(B, n_t),
        in_specs=[w_spec, b_spec, xa_spec, xh_spec],
        out_specs=out_spec,
        compiler_params=compiler_params,
    )(w2, b_col, x_pad, x_pad)


_GAINS = {"linear": 1.0, "conv1d": 1.0, "sigmoid": 1.0,
          "tanh": 5.0 / 3.0, "relu": math.sqrt(2.0)}


def init_conv_norm_params(key, in_channels, out_channels, kernel_size,
                          w_init_gain="linear"):
    """Re-implementation of the PyTorch init (xavier_uniform_ + default bias init)."""
    kw, kb = jax.random.split(key)
    gain = _GAINS[w_init_gain]
    fan_in = in_channels * kernel_size
    fan_out = out_channels * kernel_size
    bound_w = gain * math.sqrt(6.0 / (fan_in + fan_out))
    weight = jax.random.uniform(
        kw, (out_channels, in_channels, kernel_size),
        minval=-bound_w, maxval=bound_w, dtype=jnp.float32)
    bound_b = 1.0 / math.sqrt(fan_in)
    bias = jax.random.uniform(
        kb, (out_channels,), minval=-bound_b, maxval=bound_b, dtype=jnp.float32)
    return weight, bias


if __name__ == "__main__":
    key = jax.random.PRNGKey(0)

    def check(B, C_in, C_out, L, K, mxu_dtype, rtol, atol):
        k_x, k_p = jax.random.split(jax.random.fold_in(key, 131 * K + C_in))
        # Make test data exactly bf16-representable so the check is independent
        # of the MXU's f32-vs-bf16 operand-pass strategy on each generation.
        x = jax.random.normal(k_x, (B, C_in, L), dtype=jnp.float32)
        x = x.astype(jnp.bfloat16).astype(jnp.float32)
        weight, bias = init_conv_norm_params(k_p, C_in, C_out, K)
        weight = weight.astype(jnp.bfloat16).astype(jnp.float32)

        out = jax.block_until_ready(
            conv_norm_forward(x, weight, bias, mxu_dtype=mxu_dtype))

        # Reference: lax conv with the same semantics as torch Conv1d.
        ref = jax.lax.conv_general_dilated(
            x, weight, window_strides=(1,), padding=[(K // 2, K // 2)],
            dimension_numbers=("NCH", "OIH", "NCH"))
        ref = ref + bias[None, :, None]
        assert out.shape == (B, C_out, L)
        np.testing.assert_allclose(np.asarray(out), np.asarray(ref),
                                   rtol=rtol, atol=atol)

    # Exact f32 operand path (module-faithful numerics).
    check(2, 4, 8, 16, 3, None, 1e-5, 1e-5)          # kernel_size=3, "same" pad
    check(2, 4, 8, 16, 1, None, 1e-5, 1e-5)          # ConvNorm default K=1
    # Production default: bf16 MXU operands with f32 accumulation.
    check(2, 4, 8, 16, 3, jnp.bfloat16, 1e-5, 1e-5)
    check(2, 4, 8, 16, 1, jnp.bfloat16, 1e-5, 1e-5)
    print("KERNEL_OK")
</pallas_src>

<mosaic_0001>
module attributes {stable_mosaic.version = 11 : i64} {
  func.func @_conv1d_im2col_kernel(%arg0: i32, %arg1: i32, %arg2: memref<8x12xf32, #tpu.memory_space<vmem>>, %arg3: memref<8x1xf32, #tpu.memory_space<vmem>>, %arg4: memref<1x4x128xf32, #tpu.memory_space<vmem>>, %arg5: memref<1x4x128xf32, #tpu.memory_space<vmem>>, %arg6: memref<1x8x128xf32, #tpu.memory_space<vmem>>) attributes {dimension_semantics = [#tpu.dimension_semantics<parallel>, #tpu.dimension_semantics<parallel>], iteration_bounds = array<i64: 2, 1>, scalar_prefetch = 0 : i64, scratch_operands = 0 : i64, tpu.core_type = #tpu.core_type<tc>, window_params = [{pipeline_mode = #tpu.pipeline_mode<synchronous>, transform_indices = @transform_0, window_bounds = array<i64: 8, 12>}, {pipeline_mode = #tpu.pipeline_mode<synchronous>, transform_indices = @transform_1, window_bounds = array<i64: 8, 1>}, {transform_indices = @transform_2, window_bounds = array<i64: 1, 4, 128>}, {transform_indices = @transform_3, window_bounds = array<i64: 1, 4, 128>}, {transform_indices = @transform_4, window_bounds = array<i64: 1, 8, 128>}]} {
    %c0 = arith.constant 0 : index
    %c0_0 = arith.constant 0 : index
    %c0_1 = arith.constant 0 : index
    %0 = vector.load %arg4[%c0, %c0_0, %c0_1] : memref<1x4x128xf32, #tpu.memory_space<vmem>>, vector<1x4x128xf32>
    %1 = vector.shape_cast %0 : vector<1x4x128xf32> to vector<4x128xf32>
    %c0_2 = arith.constant 0 : index
    %c0_3 = arith.constant 0 : index
    %c0_4 = arith.constant 0 : index
    %2 = vector.load %arg5[%c0_2, %c0_3, %c0_4] : memref<1x4x128xf32, #tpu.memory_space<vmem>>, vector<1x4x128xf32>
    %3 = vector.shape_cast %2 : vector<1x4x128xf32> to vector<4x128xf32>
    %4 = tpu.concatenate %1, %3 in 1 : vector<4x128xf32>, vector<4x128xf32> -> vector<4x256xf32>
    %5 = vector.extract_strided_slice %4 {offsets = [0, 0], sizes = [4, 128], strides = [1, 1]} : vector<4x256xf32> to vector<4x128xf32>
    %6 = vector.extract_strided_slice %4 {offsets = [0, 1], sizes = [4, 128], strides = [1, 1]} : vector<4x256xf32> to vector<4x128xf32>
    %7 = vector.extract_strided_slice %4 {offsets = [0, 2], sizes = [4, 128], strides = [1, 1]} : vector<4x256xf32> to vector<4x128xf32>
    %8 = tpu.concatenate %5, %6, %7 in 0 : vector<4x128xf32>, vector<4x128xf32>, vector<4x128xf32> -> vector<12x128xf32>
    %c0_5 = arith.constant 0 : index
    %c0_6 = arith.constant 0 : index
    %9 = vector.load %arg2[%c0_5, %c0_6] : memref<8x12xf32, #tpu.memory_space<vmem>>, vector<8x12xf32>
    %cst = arith.constant dense<0.000000e+00> : vector<8x128xf32>
    %10 = tpu.matmul %9, %8, %cst {dimension_numbers = #tpu.dot_dimension_numbers<[1], [0], [0], [1], [0, 0, 1, 1], [], []>} : vector<8x12xf32>, vector<12x128xf32>, vector<8x128xf32> -> vector<8x128xf32>
    %c0_7 = arith.constant 0 : index
    %c0_8 = arith.constant 0 : index
    %11 = vector.load %arg3[%c0_7, %c0_8] : memref<8x1xf32, #tpu.memory_space<vmem>>, vector<8x1xf32>
    %12 = vector.broadcast %11 : vector<8x1xf32> to vector<8x128xf32>
    %13 = arith.addf %10, %12 : vector<8x128xf32>
    %c0_9 = arith.constant 0 : index
    %c0_10 = arith.constant 0 : index
    %c0_11 = arith.constant 0 : index
    %14 = vector.load %arg6[%c0_9, %c0_10, %c0_11] : memref<1x8x128xf32, #tpu.memory_space<vmem>>, vector<1x8x128xf32>
    %15 = vector.shape_cast %14 : vector<1x8x128xf32> to vector<8x128xf32>
    %16 = vector.shape_cast %13 : vector<8x128xf32> to vector<1x8x128xf32>
    tpu.vector_store %arg6[%c0_9, %c0_10, %c0_11], %16 {strides = array<i32>} : memref<1x8x128xf32, #tpu.memory_space<vmem>>, vector<1x8x128xf32>,
    return
  }
  func.func @transform_0(%arg0: i32, %arg1: i32) -> (i32, i32) {
    %c0_i32 = arith.constant 0 : i32
    %c0_i32_0 = arith.constant 0 : i32
    %c0_i32_1 = arith.constant 0 : i32
    return %c0_i32, %c0_i32_0 : i32, i32
  }
  func.func @transform_1(%arg0: i32, %arg1: i32) -> (i32, i32) {
    %c0_i32 = arith.constant 0 : i32
    %c0_i32_0 = arith.constant 0 : i32
    %c0_i32_1 = arith.constant 0 : i32
    return %c0_i32, %c0_i32_0 : i32, i32
  }
  func.func @transform_2(%arg0: i32, %arg1: i32) -> (i32, i32, i32) {
    %c0_i32 = arith.constant 0 : i32
    %c0_i32_0 = arith.constant 0 : i32
    return %arg0, %c0_i32, %arg1 : i32, i32, i32
  }
  func.func @transform_3(%arg0: i32, %arg1: i32) -> (i32, i32, i32) {
    %c1_i32 = arith.constant 1 : i32
    %0 = arith.addi %arg1, %c1_i32 : i32
    %c1_i32_0 = arith.constant 1 : i32
    %1 = arith.muli %0, %c1_i32_0 : i32
    %c0_i32 = arith.constant 0 : i32
    %c0_i32_1 = arith.constant 0 : i32
    return %arg0, %c0_i32, %1 : i32, i32, i32
  }
  func.func @transform_4(%arg0: i32, %arg1: i32) -> (i32, i32, i32) {
    %c0_i32 = arith.constant 0 : i32
    %c0_i32_0 = arith.constant 0 : i32
    return %arg0, %c0_i32, %arg1 : i32, i32, i32
  }
}

</mosaic_0001>

<bundles_post_ra>
// kernel: tpu_custom_call.1
= control target key start
LH: loop header
LB: loop body
LE: loop exit
PB: predicated region body
PF: predicated region fallthrough
CT: control target
= control target key end

     0   :  { %s958_s0 = inlined_call_operand.vmem [shape: f32[8,12], index: 0, kind: input, shape index: {}]   ;;  %s959_s1 = inlined_call_operand.vmem [shape: f32[8,1], index: 1, kind: input, shape index: {}]   ;;  %s960_s2 = inlined_call_operand.hbm [shape: f32[2,4,256], index: 2, kind: input, shape index: {}]   ;;  %s961_s3 = inlined_call_operand.hbm [shape: f32[2,4,256], index: 3, kind: input, shape index: {}]   ;;  %s962_s4 = inlined_call_operand.hbm [shape: f32[2,8,16], index: 4, kind: output, shape index: {}]  }
   0x1   :  { %963 = sst [smem:[#allocation11_spill]] %s960_s2 }
   0x2   :  { %9 = vsyncpa [#allocation3], 0 }
   0x3   :  { %11 = vsyncpa [#allocation3 + $0x1], 0 }
   0x4   :  { %12 = vsyncpa [#allocation6], 0 }
   0x5   :  { %14 = vsyncpa [#allocation6 + $0x1], 0 }
   0x6   :  { %15 = vsyncpa [#allocation4], 0 }
   0x7   :  { %17 = vsyncpa [#allocation4 + $0x1], 0  ;;  %s784_s15 = smov 0   ;;  %s786_s16 = smov 0  }
   0x8   :  { %s788_s17 = smov 0   ;;  %s790_s18 = smov 0  }
   0x9   :  { %s792_s19 = smov 0   ;;  %s794_s20 = smov 0  }
   0xa LB: > { %s503_s21 = sadd.s32 4294967295, %s749_s20   ;;  %s504_s22 = sadd.s32 4294967294, %s749_s20   ;;  %s749_s20 = sphi %s794_s20, %s23_s20   ;;  %s745_s19 = sphi %s792_s19, %s976_s19   ;;  %s741_s18 = sphi %s790_s18, %s975_s18   ;;  %s737_s17 = sphi %s788_s17, %s974_s17   ;;  %s733_s16 = sphi %s786_s16, %s973_s16   ;;  %s729_s15 = sphi %s784_s15, %s972_s15  }
   0xb   : > { %s35_s23 = sadd.s32 1, %s745_s19  ;;  %s86_s24 = sadd.s32 1, %s737_s17 }
   0xc   : > { %p37_p0 = scmp.ge.s32.totalorder %s35_s23, 2  ;;  %p93_p1 = scmp.ne.s32.totalorder %s737_s17, %s733_s16 }
   0xd   : > { %p94_p2 = scmp.eq.s32.totalorder %s749_s20, 0  ;;  %p99_p3 = scmp.ne.s32.totalorder %s733_s16, %s729_s15 }
   0xe   : > { %s978_s23 = smov (%p37_p0, %s35_s23), 0  ;;  %p100_p5 = scmp.eq.s32.totalorder %s503_s21, 0 }
   0xf   : > { %p825_p4 = por %p94_p2, %p93_p1  ;;  %s81_s26 = ssub.s32 %s745_s19, %s978_s23 }
  0x10   : > { %p155_p6 = scmp.eq.s32.totalorder %s503_s21, 1  ;;  %p84_p7 = scmp.eq.s32.totalorder %s81_s26, 0 }
  0x11   : > { %p831_p8 = por %p100_p5, %p99_p3  ;;  %p161_p10 = scmp.eq.s32.totalorder %s504_s22, 1 }
  0x12   : > { %p835_p9 = por %p155_p6, %p93_p1  ;;  %p552_p13 = scmp.lt.s32.totalorder %s749_s20, 2 }
  0x13   : > { %s840_s29 = scalar_select %p84_p7, %s737_s17, %s86_s24  }
  0x14   : > { %p842_p11 = por %p161_p10, %p99_p3  ;;  %s849_s5 = sand.u32 1, %s737_s17  }
  0x15   : > { %s507_s6 = sshll.u32 %s849_s5, 2  ;;  %s523_s7 = sshll.u32 %s745_s19, 7 }
  0x16   : > { %s968_s2 = sld [smem:[#allocation11_spill]]  ;;  %s191_s11 = scalar_lea.vmem [#allocation2], %s507_s6 }
  0x17   : > { %s200_s12 = sshll.u32 %s191_s11, 4  ;;  %p858_p0 = pnand %p552_p13, %p825_p4  ;;  %s201_s12 = int_to_ptr.vmem [resolvable:$true] %s200_s12 }
  0x18   : > { %p513_p1 = scmp.ge.s32.totalorder %s749_s20, 1  ;;  %p226_p2 = scmp.lt.s32.totalorder %s749_s20, 3 }
  0x19   : > { %s188_s14 = scalar_lea.sflag [#allocation3], %s849_s5  ;;  %p610_p3 = pneg %p858_p0 }
  0x1a   : > { %s621_s21 = scalar_lea.vmem %s201_s12, 64  ;;  %s751_s22 = smov [#allocation2]  }
  0x1b   : > { %p622_p5 = scmp.ne.s32.totalorder %s201_s12, %s621_s21  ;;  %s626_s24 = sshll.u32 %s751_s22, 4  ;;  %s627_s24 = int_to_ptr.vmem [resolvable:$false] %s626_s24 }
  0x1c   : > { %s198_s10 = scalar_lea.hbm %s968_s2, %s523_s7  ;;  %s628_s25 = scalar_lea.vmem %s627_s24, 128 }
  0x1d   : > { %p624_p6 = pnand %p622_p5, %p610_p3  ;;  %p629_p4 = scmp.lt.s32.totalorder %s201_s12, %s627_s24 }
  0x1e   : > { %p630_p10 = scmp.lt.s32.totalorder %s628_s25, %s621_s21 }
  0x1f   : > { %p625_p7 = pneg %p624_p6 }
  0x20   : > { %p631_p13 = por %p630_p10, %p629_p4 }
  0x22   : > { %p632_p12 = pnand %p631_p13, %p625_p7 }
  0x24   : > { %635 = shalt.err (!%p632_p12)
}
  0x25   : > { %544 = dma.hbm_to_vmem [thread:$0]  (!%p858_p0), %s198_s10, 64, %s201_s12, %s188_s14  }
  0x26   : > { %p876_p5 = pnand %p513_p1, %p226_p2  ;;  %s436_s11 = scalar_lea.hbm %s961_s3, %s523_s7 }
  0x27   : > { %s211_s21 = scalar_lea.vmem [#allocation5], %s507_s6  ;;  %s437_s24 = scalar_lea.hbm %s436_s11, 64 }
  0x28   : > { %s221_s22 = sshll.u32 %s211_s21, 4  ;;  %s208_s25 = scalar_lea.sflag [#allocation6], %s849_s5  ;;  %s222_s22 = int_to_ptr.vmem [resolvable:$true] %s221_s22 }
  0x29   : > { %s649_s2 = scalar_lea.vmem %s222_s22, 64  ;;  %s752_s10 = smov [#allocation5]  }
  0x2a   : > { %p650_p12 = scmp.ne.s32.totalorder %s222_s22, %s649_s2  ;;  %s654_s12 = sshll.u32 %s752_s10, 4  ;;  %s655_s12 = int_to_ptr.vmem [resolvable:$false] %s654_s12 }
  0x2b   : > { %s656_s14 = scalar_lea.vmem %s655_s12, 128  ;;  %p657_p1 = scmp.lt.s32.totalorder %s222_s22, %s655_s12 }
  0x2c   : > { %p652_p6 = pnand %p650_p12, %p610_p3  ;;  %p658_p2 = scmp.lt.s32.totalorder %s656_s14, %s649_s2 }
  0x2e   : > { %p653_p7 = pneg %p652_p6  ;;  %p659_p4 = por %p658_p2, %p657_p1 }
  0x30   : > { %p660_p10 = pnand %p659_p4, %p653_p7 }
  0x32   : > { %663 = shalt.err (!%p660_p10)
}
  0x33   : > { %547 = dma.hbm_to_vmem [thread:$0]  (!%p858_p0), %s437_s24, 64, %s222_s22, %s208_s25  }
  0x34   : > { %230 = sbr.rel (%p876_p5) target bundleno = 394 (0x18a), region = 36  ;;  %s892_s5 = sand.u32 (!%p876_p5), 1, %s733_s16  }
  0x35   : > { %s514_s6 = sshll.u32 (!%p876_p5), %s892_s5, 2  ;;  %s233_s7 = scalar_lea.sflag (!%p876_p5), [#allocation3], %s892_s5 }
  0x36   : > { %s236_s8 = scalar_lea.vmem (!%p876_p5), [#allocation2], %s514_s6 }
  0x39   : > { %716 = dma.done.wait (%p831_p8), %s233_s7, 64  }
  0x3a   : > { %718 = vsyncadd (%p831_p8), %s233_s7, 4294967232  ;;  %s242_s2 = scalar_lea.sflag [#allocation6], %s892_s5  ;;  %s245_s13 = scalar_lea.vmem [#allocation5], %s514_s6 }
  0x3b   : > { %720 = dma.done.wait (%p831_p8), %s242_s2, 64  }
  0x3c   : > { %722 = vsyncadd (%p831_p8), %s242_s2, 4294967232  ;;  %v753_v0 = vmov 0.0   ;;  %vm754_vm0 = vmmov 0   ;;  %v755_v1 = vmov 0   ;;  %v276_v2 = vld [vmem:[%s236_s8] sm:$0xf] }
  0x3d   : > { %528 = vmatprep.subr.mxu0 %v753_v0  ;;  %532 = vmatprep.mubr.msk.f32.mxu0 %vm754_vm0, %v753_v0  ;;  %v277_v3 = vld [vmem:[%s245_s13] sm:$0xf]  ;;  %s756_s26 = smov 126   ;;  %v280_v4 = vrot.slane %v276_v2, 4  ;;  %s757_s9 = smov 127   ;;  %v298_v6 = vld [vmem:[%s959_s1] sm:$0xff] }
  0x3e   : > { %607 = vset.pattern.permute.xlu0 %v755_v1  ;;  %v281_v5 = vrot.slane %v277_v3, 4  ;;  %vm293_vm1 = vcmask 1031168   ;;  %vm295_vm2 = vcmask 1043456   ;;  %vm286_vm3 = vcmask 1039360   ;;  %v297_v13 = vld [vmem:[%s958_s0] sm:$0xff]  ;;  %s516_s24 = sshll.u32 %s892_s5, 3 }
  0x3f   : > { %289 = vrot.lane.b32.xlu0 %v276_v2, %s756_s26  ;;  %282 = vrot.lane.b32.xlu1 %v280_v4, %s757_s9  ;;  %vm304_vm4 = vcmask 97280   ;;  %s520_s25 = sshll.u32 %s741_s18, 7  ;;  %s274_s10 = scalar_lea.vmem [#allocation7], %s516_s24 }
  0x40   : > { %s396_s12 = sshll.u32 %s274_s10, 4  ;;  %s916_s7 = scalar_lea.hbm %s962_s4, %s520_s25  ;;  %s397_s12 = int_to_ptr.vmem [resolvable:$true] %s396_s12 }
  0x41   : > { %s382_s8 = scalar_lea.sflag [#allocation4], %s892_s5  ;;  %s665_s2 = scalar_lea.vmem %s397_s12, 128 }
  0x42   : > { %p666_p8 = scmp.ne.s32.totalorder %s397_s12, %s665_s2  ;;  %s758_s13 = smov [#allocation7]  }
  0x43   : > { %291 = vrot.lane.b32.xlu0 %v277_v3, %s756_s26  ;;  %284 = vrot.lane.b32.xlu1 %v281_v5, %s757_s9  ;;  %s669_s18 = sshll.u32 %s758_s13, 4  ;;  %s670_s18 = int_to_ptr.vmem [resolvable:$false] %s669_s18 }
  0x44   : > { %p667_p0 = pnand %p666_p8, %p835_p9  ;;  %s671_s26 = scalar_lea.vmem %s670_s18, 256 }
  0x45   : > { %p672_p13 = scmp.lt.s32.totalorder %s397_s12, %s670_s18  ;;  %p673_p5 = scmp.lt.s32.totalorder %s671_s26, %s665_s2 }
  0x46   : > { %p668_p3 = pneg %p667_p0 }
  0x47   : > { %301 = vperm.xlu0 %607, %v298_v6   ;;  %p674_p12 = por %p673_p5, %p672_p13 }
  0x49   : > { %p675_p6 = pnand %p674_p12, %p668_p3 }
  0xb1   : > { %v290_v7 = vpop.permute.xlu0 %289  ;;  %v283_v8 = vpop.permute.xlu1 %282 }
  0xb5   : > { %v292_v9 = vpop.permute.xlu0 %291  ;;  %v285_v11 = vpop.permute.xlu1 %284 }
  0xb6   : > { %v294_v10 = vsel %vm293_vm1, %v290_v7, %v292_v9  ;;  %v287_v12 = vsel %vm286_vm3, %v283_v8, %v285_v11 }
  0xb7   : > { %529 = vmatpush3.msk.msra.mxu0 %vm295_vm2, %v294_v10  ;;  %v296_v14 = vsel %vm295_vm2, %v276_v2, %v287_v12 }
  0xb8   : > { %530 = vmatprep.subr.mxu0 %v753_v0 }
  0xb9   : > { %531 = vmatpush3.msra.mxu0 %v296_v14 }
  0xba   : > { %533 = vmatmul.mubr.msk.f32.vlgmr.msra.gmra.mxu0 %vm304_vm4, %v297_v13 }
  0xc2   : > { %v302_v15 = vpop.permute.xlu0 %301 }
 0x17a   : > { %v376_v16 = vpop.f32.mrf.mxu0 }
 0x17b   : > { %v377_v17 = vadd.f32 %v376_v16, %v302_v15 }
 0x17c   : > { %v534_v18 = vpop.f32.mrf.mxu0 }
 0x17d   : > { %380 = vst [vmem:[%s274_s10] sm:$0xff] %v377_v17 }
 0x17e   : > { %678 = shalt.err (!%p675_p6)
}
 0x17f   : > { %s679_s9 = scalar_lea.hbm %s916_s7, 128  ;;  %s683_s21 = scalar_lea.hbm %s962_s4, 256 }
 0x180   : > { %p680_p7 = scmp.ne.s32.totalorder %s916_s7, %s679_s9  ;;  %p684_p4 = scmp.lt.s32.totalorder %s916_s7, %s962_s4 }
 0x181   : > { %p685_p10 = scmp.lt.s32.totalorder %s683_s21, %s679_s9 }
 0x182   : > { %p681_p1 = pnand %p680_p7, %p835_p9 }
 0x183   : > { %p686_p8 = por %p685_p10, %p684_p4 }
 0x184   : > { %p682_p2 = pneg %p681_p1 }
 0x186   : > { %p687_p0 = pnand %p686_p8, %p682_p2 }
 0x188   : > { %690 = shalt.err (!%p687_p0)
}
 0x189   : > { %539 = dma.vmem_to_hbm [thread:$0]  (%p835_p9), %s397_s12, 128, %s916_s7, %s382_s8  }
 0x18a PF: > { %s408_s24 = sand.u32 1, %s729_s15   ;;  %p971_p3 = scmp.ge.s32.totalorder %s749_s20, 2 }
 0x18b   : > { %s409_s25 = scalar_lea.sflag [#allocation4], %s408_s24 }
 0x18c   : > { %p549_p13 = pnand %p971_p3, %p842_p11 }
 0x18e   : > { %p550_p5 = pneg %p549_p13 }
 0x190   : > { %724 = dma.done.wait (%p550_p5), %s409_s25, 128  }
 0x191   : > { %726 = vsyncadd (%p550_p5), %s409_s25, 4294967168  ;;  %s23_s20 = sadd.s32 1, %s749_s20   ;;  %s972_s15 = smov %s733_s16 }
 0x192   : > { %p20_p12 = scmp.ge.s32.totalorder %s23_s20, 4   ;;  %s973_s16 = smov %s737_s17 }
 0x193   : > { %s974_s17 = smov %s840_s29  ;;  %s975_s18 = smov %s745_s19 }
 0x194   : > { %s976_s19 = smov %s978_s23  ;;  %22 = sbr.rel (!%p20_p12) target bundleno = 10 (0xa), region = 94 }
 0x199   :  { %414 = vsyncpa [#allocation3], 1 }
 0x19a   :  { %416 = vsyncpa [#allocation3 + $0x1], 1 }
 0x19b   :  { %417 = vsyncpa [#allocation6], 1 }
 0x19c   :  { %419 = vsyncpa [#allocation6 + $0x1], 1 }
 0x19d   :  { %420 = vsyncpa [#allocation4], 1 }
 0x19e   :  { %422 = vsyncpa [#allocation4 + $0x1], 1 }

</bundles_post_ra>
